<compile_context>
chip_gen: v7x
topology: tpu7x:2x2x1
jax: 0.10.0
libtpu: 0.0.40
codegen_flags: <defaults>
</compile_context>

<pallas_src>
import math

import jax
import jax.numpy as jnp
from jax.experimental import pallas as pl
from jax.experimental.pallas import tpu as pltpu


def _round_up(n, m):
    return ((n + m - 1) // m) * m


def _vmem_limit_bytes(*nbytes):
    """Scoped-VMEM limit with generous double-buffer headroom over live buffers."""
    need = 4 * int(sum(int(n) for n in nbytes)) + (4 << 20)
    return int(min(64 << 20, max(32 << 20, need)))


def _gate_mask(rows, hidden):
    """Lane mask selecting the g (tanh) columns, or None when H is lane-aligned
    (exact per-gate slices are then cheaper than the dual-activation trick)."""
    if hidden % 128 == 0:
        return None
    lane = jax.lax.broadcasted_iota(jnp.int32, (rows, 4 * hidden), 1)
    return (lane >= 2 * hidden) & (lane < 3 * hidden)


def _gate_epilogue(gates, c_prev, hidden, g_mask):
    """LSTM epilogue on an f32 [rows, 4H] gates tile laid out [i | f | g | o]."""
    H = hidden
    assert gates.shape[-1] == 4 * H, "gates tile must be exactly [rows, 4H]"
    if g_mask is None:
        # Lane-aligned H: exact activations on aligned slices (half the EUP work).
        sig_if = jax.nn.sigmoid(gates[:, :2 * H])
        i_g, f_g = sig_if[:, :H], sig_if[:, H:]
        g_g = jnp.tanh(gates[:, 2 * H:3 * H])
        o_g = jax.nn.sigmoid(gates[:, 3 * H:])
    else:
        # H not a lane multiple: two full-tile EUP passes + one VPU select avoid
        # unaligned-slice relayouts on the activation inputs.
        act = jnp.where(g_mask, jnp.tanh(gates), jax.nn.sigmoid(gates))
        i_g, f_g = act[:, :H], act[:, H:2 * H]
        g_g, o_g = act[:, 2 * H:3 * H], act[:, 3 * H:]
    c_next = i_g * g_g + f_g * c_prev
    h_next = o_g * jnp.tanh(c_next)
    return h_next, c_next


# ----------------------------- single cell step -----------------------------

def _lstm_cell_kernel(x_ref, h_ref, c_ref, w_ref, r_ref, b_ref, out_ref):
    H = c_ref.shape[-1]
    wt = w_ref.dtype
    gates = (jnp.dot(x_ref[...].astype(wt), w_ref[...],
                     preferred_element_type=jnp.float32)
             + jnp.dot(h_ref[...].astype(wt), r_ref[...],
                       preferred_element_type=jnp.float32)
             + b_ref[...].astype(jnp.float32))
    h_next, c_next = _gate_epilogue(gates, c_ref[...].astype(jnp.float32), H,
                                    _gate_mask(gates.shape[0], H))
    # Single packed [bb, 2H] store (one coalesced writeback instead of two
    # half-width masked stores).
    out_ref[...] = jnp.concatenate([h_next, c_next], axis=-1).astype(out_ref.dtype)


def lstm_cell_pallas(x, h, c, W, R, b, *, block_b=256, param_dtype=None):
    """One LSTMCell step (the module's forward). Returns (h_next, c_next).

    W: [IN, 4H], R: [H, 4H], b: [4H], gate order [i | f | g | o].
    """
    B, IN = x.shape
    H = h.shape[-1]
    G = 4 * H
    if param_dtype is not None:
        W, R, b = W.astype(param_dtype), R.astype(param_dtype), b.astype(param_dtype)
    b2 = b.reshape(1, G)

    # Batch tiling on a "parallel" grid axis (sharded across TCs on v7x).
    bb = min(block_b, _round_up(B, 8))
    Bp = _round_up(B, bb)
    if Bp != B:
        pad = ((0, Bp - B), (0, 0))
        x, h, c = jnp.pad(x, pad), jnp.pad(h, pad), jnp.pad(c, pad)

    vmem_limit = _vmem_limit_bytes(
        W.nbytes, R.nbytes, b2.nbytes,
        bb * IN * x.dtype.itemsize, 2 * bb * H * h.dtype.itemsize,
        bb * 2 * H * h.dtype.itemsize)

    out = pl.pallas_call(
        _lstm_cell_kernel,
        grid=(Bp // bb,),
        in_specs=[
            pl.BlockSpec((bb, IN), lambda i: (i, 0)),
            pl.BlockSpec((bb, H), lambda i: (i, 0)),
            pl.BlockSpec((bb, H), lambda i: (i, 0)),
            pl.BlockSpec((IN, G), lambda i: (0, 0)),   # resident weights
            pl.BlockSpec((H, G), lambda i: (0, 0)),
            pl.BlockSpec((1, G), lambda i: (0, 0)),
        ],
        out_specs=pl.BlockSpec((bb, 2 * H), lambda i: (i, 0)),
        out_shape=jax.ShapeDtypeStruct((Bp, 2 * H), h.dtype),
        compiler_params=pltpu.CompilerParams(
            dimension_semantics=("parallel",),
            vmem_limit_bytes=vmem_limit),
    )(x, h, c, W, R, b2)
    return out[:B, :H], out[:B, H:]


# ---------------- hoisted T-parallel input projection (xs@W + b) -------------

def _proj_kernel(x_ref, w_ref, b_ref, o_ref):
    xw = jnp.dot(x_ref[...].astype(w_ref.dtype), w_ref[...],
                 preferred_element_type=jnp.float32)
    o_ref[...] = (xw + b_ref[...].astype(jnp.float32)).astype(o_ref.dtype)


def _project_inputs(xs, W, b, out_dtype, *, block_rows=256):
    """One row-tiled matmul [T*B, IN] @ [IN, 4H] + b (bias folded in here)."""
    T, B, IN = xs.shape
    G = W.shape[-1]
    TB = T * B
    x2 = xs.reshape(TB, IN)
    bm = min(block_rows, _round_up(TB, 8))
    TBp = _round_up(TB, bm)
    if TBp != TB:
        x2 = jnp.pad(x2, ((0, TBp - TB), (0, 0)))
    vmem_limit = _vmem_limit_bytes(
        W.nbytes, b.nbytes, bm * IN * x2.dtype.itemsize,
        bm * G * jnp.dtype(out_dtype).itemsize)
    xp = pl.pallas_call(
        _proj_kernel,
        grid=(TBp // bm,),
        in_specs=[
            pl.BlockSpec((bm, IN), lambda i: (i, 0)),
            pl.BlockSpec((IN, G), lambda i: (0, 0)),
            pl.BlockSpec((1, G), lambda i: (0, 0)),
        ],
        out_specs=pl.BlockSpec((bm, G), lambda i: (i, 0)),
        out_shape=jax.ShapeDtypeStruct((TBp, G), out_dtype),
        compiler_params=pltpu.CompilerParams(
            dimension_semantics=("parallel",),
            vmem_limit_bytes=vmem_limit),
    )(x2, W, b.reshape(1, G))
    return xp[:TB].reshape(T, B, G)


# ------------------ full sequence, time-chunked recurrence -------------------

def _lstm_seq_kernel(xp_ref, r_ref, h0_ref, c0_ref, hs_ref, cT_ref, h_sc, c_sc):
    Tb, B, _ = xp_ref.shape
    H = c0_ref.shape[-1]

    @pl.when(pl.program_id(0) == 0)
    def _init():
        h_sc[...] = h0_ref[...].astype(h_sc.dtype)
        c_sc[...] = c0_ref[...].astype(jnp.float32)

    # Loop-invariant gate mask hoisted out of the unrolled time loop
    # (JAX does not CSE iota/broadcast across iterations).
    g_mask = _gate_mask(B, H)

    def step(k, carry):
        # Only the recurrent half of the projection stays in the serial loop;
        # x@W + b was hoisted into one large batched matmul (xp_ref stream).
        gates = xp_ref[k].astype(jnp.float32) + jnp.dot(
            h_sc[...], r_ref[...], preferred_element_type=jnp.float32)
        h_next, c_next = _gate_epilogue(gates, c_sc[...], H, g_mask)
        h_sc[...] = h_next.astype(h_sc.dtype)   # carried recurrent state (VMEM)
        c_sc[...] = c_next                      # carried cell state (f32 VMEM)
        hs_ref[k] = h_next.astype(hs_ref.dtype)
        return carry

    jax.lax.fori_loop(0, Tb, step, 0, unroll=True)

    # Constant-index output block: value after the last grid step wins.
    cT_ref[...] = c_sc[...].astype(cT_ref.dtype)


def lstm_sequence_pallas(xs, h0, c0, W, R, b, *, time_block=8, param_dtype=None):
    """Run the cell over xs [T, B, IN]; returns (hs [T, B, H], h_T, c_T)."""
    T, B, IN = xs.shape
    H = h0.shape[-1]
    G = 4 * H
    out_dtype = h0.dtype
    if param_dtype is not None:
        W, R, b = W.astype(param_dtype), R.astype(param_dtype), b.astype(param_dtype)
    stream_dtype = R.dtype   # x_proj stream + carried-h matmul operand dtype

    # (1) Hoisted, MXU-filling input projection (bias folded in).
    xp = _project_inputs(xs, W, b, stream_dtype)            # [T, B, 4H]

    # (2) Time chunking: Tb timesteps per grid step (Tb must divide T exactly).
    Tb = max(1, min(time_block, T))
    if T % Tb:
        Tb = math.gcd(T, Tb)

    vmem_limit = _vmem_limit_bytes(
        R.nbytes, 2 * B * H * jnp.dtype(out_dtype).itemsize,
        Tb * B * G * jnp.dtype(stream_dtype).itemsize,
        Tb * B * H * jnp.dtype(out_dtype).itemsize,
        B * H * (jnp.dtype(stream_dtype).itemsize + 4))

    hs, cT = pl.pallas_call(
        _lstm_seq_kernel,
        grid=(T // Tb,),
        in_specs=[
            pl.BlockSpec((Tb, B, G), lambda i: (i, 0, 0)),   # x_proj chunk
            pl.BlockSpec((H, G), lambda i: (0, 0)),          # R resident in VMEM
            pl.BlockSpec((B, H), lambda i: (0, 0)),          # h0 resident
            pl.BlockSpec((B, H), lambda i: (0, 0)),          # c0 resident
        ],
        out_specs=(
            pl.BlockSpec((Tb, B, H), lambda i: (i, 0, 0)),   # hs chunk writeback
            pl.BlockSpec((B, H), lambda i: (0, 0)),          # final c
        ),
        out_shape=(
            jax.ShapeDtypeStruct((T, B, H), out_dtype),
            jax.ShapeDtypeStruct((B, H), out_dtype),
        ),
        scratch_shapes=[
            pltpu.VMEM((B, H), stream_dtype),   # carried h (matmul-operand dtype)
            pltpu.VMEM((B, H), jnp.float32),    # carried c (f32 epilogue state)
        ],
        compiler_params=pltpu.CompilerParams(
            # State is carried in VMEM scratch across grid steps -> the time
            # axis must stay sequential; parallelize only batch/sequence axes.
            dimension_semantics=("arbitrary",),
            vmem_limit_bytes=vmem_limit),
    )(xp, R, h0, c0)
    return hs, hs[-1], cT


# --------------------------------- references --------------------------------

def lstm_cell_reference(x, h, c, W, R, b):
    hi = jax.lax.Precision.HIGHEST
    gates = jnp.dot(x, W, precision=hi) + jnp.dot(h, R, precision=hi) + b
    H = h.shape[-1]
    i_g = jax.nn.sigmoid(gates[:, :H])
    f_g = jax.nn.sigmoid(gates[:, H:2 * H])
    g_g = jnp.tanh(gates[:, 2 * H:3 * H])
    o_g = jax.nn.sigmoid(gates[:, 3 * H:])
    c_next = i_g * g_g + f_g * c
    h_next = o_g * jnp.tanh(c_next)
    return h_next, c_next


def lstm_sequence_reference(xs, h0, c0, W, R, b):
    def step(carry, x):
        h, c = carry
        h2, c2 = lstm_cell_reference(x, h, c, W, R, b)
        return (h2, c2), h2
    (hT, cT), hs = jax.lax.scan(step, (h0, c0), xs)
    return hs, hT, cT


if __name__ == "__main__":
    INPUT, HIDDEN, BATCH, SEQ = 16, 32, 8, 8

    keys = jax.random.split(jax.random.PRNGKey(0), 16)

    def init(k, shape, scale=0.1):
        return scale * jax.random.normal(k, shape, dtype=jnp.float32)

    # Per-gate parameters, PyTorch nn.Linear convention: weight [out, in];
    # only the input projections carry a bias (matches the module).
    w_i, b_i = init(keys[0], (HIDDEN, INPUT)), init(keys[1], (HIDDEN,))
    w_f, b_f = init(keys[2], (HIDDEN, INPUT)), init(keys[3], (HIDDEN,))
    w_g, b_g = init(keys[4], (HIDDEN, INPUT)), init(keys[5], (HIDDEN,))
    w_o, b_o = init(keys[6], (HIDDEN, INPUT)), init(keys[7], (HIDDEN,))
    r_i = init(keys[8], (HIDDEN, HIDDEN))
    r_f = init(keys[9], (HIDDEN, HIDDEN))
    r_g = init(keys[10], (HIDDEN, HIDDEN))
    r_o = init(keys[11], (HIDDEN, HIDDEN))

    # Pack gates column-wise (transpose to [in, out]), order [i | f | g | o].
    W = jnp.concatenate([w_i.T, w_f.T, w_g.T, w_o.T], axis=1)    # [IN, 4H]
    R = jnp.concatenate([r_i.T, r_f.T, r_g.T, r_o.T], axis=1)    # [H, 4H]
    b = jnp.concatenate([b_i, b_f, b_g, b_o])                    # [4H]

    x = jax.random.normal(keys[12], (BATCH, INPUT), dtype=jnp.float32)
    h = jax.random.normal(keys[13], (BATCH, HIDDEN), dtype=jnp.float32)
    c = jax.random.normal(keys[14], (BATCH, HIDDEN), dtype=jnp.float32)
    xs = jax.random.normal(keys[15], (SEQ, BATCH, INPUT), dtype=jnp.float32)

    # --- single cell step (the module's forward) ------------------------------
    h1, c1 = lstm_cell_pallas(x, h, c, W, R, b)
    jax.block_until_ready((h1, c1))
    h1e, c1e = lstm_cell_reference(x, h, c, W, R, b[None, :])
    assert jnp.allclose(h1, h1e, atol=5e-3, rtol=5e-3), "cell h mismatch"
    assert jnp.allclose(c1, c1e, atol=5e-3, rtol=5e-3), "cell c mismatch"

    # --- full sequence, f32 params --------------------------------------------
    hs, hT, cT = lstm_sequence_pallas(xs, h, c, W, R, b, time_block=SEQ)
    jax.block_until_ready((hs, hT, cT))
    hse, hTe, cTe = lstm_sequence_reference(xs, h, c, W, R, b[None, :])
    assert jnp.allclose(hs, hse, atol=5e-3, rtol=5e-3), "seq hs mismatch"
    assert jnp.allclose(hT, hTe, atol=5e-3, rtol=5e-3), "seq h_T mismatch"
    assert jnp.allclose(cT, cTe, atol=5e-3, rtol=5e-3), "seq c_T mismatch"

    # --- bf16 weights / streamed projection, f32 accumulation -----------------
    hs_b, hT_b, cT_b = lstm_sequence_pallas(
        xs, h, c, W, R, b, time_block=SEQ, param_dtype=jnp.bfloat16)
    jax.block_until_ready((hs_b, hT_b, cT_b))
    assert jnp.allclose(hs_b, hse, atol=3e-2, rtol=3e-2), "bf16 hs mismatch"
    assert jnp.allclose(cT_b, cTe, atol=3e-2, rtol=3e-2), "bf16 c_T mismatch"

    print("KERNEL_OK")
</pallas_src>

<mosaic_0001>
module attributes {stable_mosaic.version = 11 : i64} {
  func.func @_lstm_cell_kernel(%arg0: i32, %arg1: memref<8x16xf32, #tpu.memory_space<vmem>>, %arg2: memref<8x32xf32, #tpu.memory_space<vmem>>, %arg3: memref<8x32xf32, #tpu.memory_space<vmem>>, %arg4: memref<16x128xf32, #tpu.memory_space<vmem>>, %arg5: memref<32x128xf32, #tpu.memory_space<vmem>>, %arg6: memref<1x128xf32, #tpu.memory_space<vmem>>, %arg7: memref<8x64xf32, #tpu.memory_space<vmem>>) attributes {dimension_semantics = [#tpu.dimension_semantics<parallel>], iteration_bounds = array<i64: 1>, scalar_prefetch = 0 : i64, scratch_operands = 0 : i64, tpu.core_type = #tpu.core_type<tc>, window_params = [{transform_indices = @transform_0, window_bounds = array<i64: 8, 16>}, {transform_indices = @transform_1, window_bounds = array<i64: 8, 32>}, {transform_indices = @transform_2, window_bounds = array<i64: 8, 32>}, {pipeline_mode = #tpu.pipeline_mode<synchronous>, transform_indices = @transform_3, window_bounds = array<i64: 16, 128>}, {pipeline_mode = #tpu.pipeline_mode<synchronous>, transform_indices = @transform_4, window_bounds = array<i64: 32, 128>}, {pipeline_mode = #tpu.pipeline_mode<synchronous>, transform_indices = @transform_5, window_bounds = array<i64: 1, 128>}, {transform_indices = @transform_6, window_bounds = array<i64: 8, 64>}]} {
    %c0 = arith.constant 0 : index
    %c0_0 = arith.constant 0 : index
    %0 = vector.load %arg1[%c0, %c0_0] : memref<8x16xf32, #tpu.memory_space<vmem>>, vector<8x16xf32>
    %c0_1 = arith.constant 0 : index
    %c0_2 = arith.constant 0 : index
    %1 = vector.load %arg4[%c0_1, %c0_2] : memref<16x128xf32, #tpu.memory_space<vmem>>, vector<16x128xf32>
    %cst = arith.constant dense<0.000000e+00> : vector<8x128xf32>
    %2 = tpu.matmul %0, %1, %cst {dimension_numbers = #tpu.dot_dimension_numbers<[1], [0], [0], [1], [0, 0, 1, 1], [], []>} : vector<8x16xf32>, vector<16x128xf32>, vector<8x128xf32> -> vector<8x128xf32>
    %c0_3 = arith.constant 0 : index
    %c0_4 = arith.constant 0 : index
    %3 = vector.load %arg2[%c0_3, %c0_4] : memref<8x32xf32, #tpu.memory_space<vmem>>, vector<8x32xf32>
    %c0_5 = arith.constant 0 : index
    %c0_6 = arith.constant 0 : index
    %4 = vector.load %arg5[%c0_5, %c0_6] : memref<32x128xf32, #tpu.memory_space<vmem>>, vector<32x128xf32>
    %cst_7 = arith.constant dense<0.000000e+00> : vector<8x128xf32>
    %5 = tpu.matmul %3, %4, %cst_7 {dimension_numbers = #tpu.dot_dimension_numbers<[1], [0], [0], [1], [0, 0, 1, 1], [], []>} : vector<8x32xf32>, vector<32x128xf32>, vector<8x128xf32> -> vector<8x128xf32>
    %6 = arith.addf %2, %5 : vector<8x128xf32>
    %c0_8 = arith.constant 0 : index
    %c0_9 = arith.constant 0 : index
    %7 = vector.load %arg6[%c0_8, %c0_9] : memref<1x128xf32, #tpu.memory_space<vmem>>, vector<1x128xf32>
    %8 = vector.broadcast %7 : vector<1x128xf32> to vector<8x128xf32>
    %9 = arith.addf %6, %8 : vector<8x128xf32>
    %c0_10 = arith.constant 0 : index
    %c0_11 = arith.constant 0 : index
    %10 = vector.load %arg3[%c0_10, %c0_11] : memref<8x32xf32, #tpu.memory_space<vmem>>, vector<8x32xf32>
    %11 = tpu.iota {dimensions = array<i32: 1>} : vector<8x128xi32>
    %c64_i32 = arith.constant 64 : i32
    %12 = vector.broadcast %c64_i32 : i32 to vector<8x128xi32>
    %13 = arith.cmpi sge, %11, %12 : vector<8x128xi32>
    %c96_i32 = arith.constant 96 : i32
    %14 = vector.broadcast %c96_i32 : i32 to vector<8x128xi32>
    %15 = arith.cmpi slt, %11, %14 : vector<8x128xi32>
    %16 = arith.andi %13, %15 : vector<8x128xi1>
    %17 = math.tanh %9 : vector<8x128xf32>
    %18 = arith.negf %9 : vector<8x128xf32>
    %19 = math.exp %18 : vector<8x128xf32>
    %cst_12 = arith.constant 1.000000e+00 : f32
    %20 = vector.broadcast %cst_12 : f32 to vector<8x128xf32>
    %21 = arith.addf %20, %19 : vector<8x128xf32>
    %22 = arith.divf %20, %21 : vector<8x128xf32>
    %23 = arith.select %16, %17, %22 : vector<8x128xi1>, vector<8x128xf32>
    %24 = vector.extract_strided_slice %23 {offsets = [0, 0], sizes = [8, 32], strides = [1, 1]} : vector<8x128xf32> to vector<8x32xf32>
    %25 = vector.extract_strided_slice %23 {offsets = [0, 32], sizes = [8, 32], strides = [1, 1]} : vector<8x128xf32> to vector<8x32xf32>
    %26 = vector.extract_strided_slice %23 {offsets = [0, 64], sizes = [8, 32], strides = [1, 1]} : vector<8x128xf32> to vector<8x32xf32>
    %27 = vector.extract_strided_slice %23 {offsets = [0, 96], sizes = [8, 32], strides = [1, 1]} : vector<8x128xf32> to vector<8x32xf32>
    %28 = arith.mulf %24, %26 : vector<8x32xf32>
    %29 = arith.mulf %25, %10 : vector<8x32xf32>
    %30 = arith.addf %28, %29 : vector<8x32xf32>
    %31 = math.tanh %30 : vector<8x32xf32>
    %32 = arith.mulf %27, %31 : vector<8x32xf32>
    %33 = tpu.concatenate %32, %30 in 1 : vector<8x32xf32>, vector<8x32xf32> -> vector<8x64xf32>
    %c0_13 = arith.constant 0 : index
    %c0_14 = arith.constant 0 : index
    %34 = vector.load %arg7[%c0_13, %c0_14] : memref<8x64xf32, #tpu.memory_space<vmem>>, vector<8x64xf32>
    tpu.vector_store %arg7[%c0_13, %c0_14], %33 {strides = array<i32>} : memref<8x64xf32, #tpu.memory_space<vmem>>, vector<8x64xf32>,
    return
  }
  func.func @transform_0(%arg0: i32) -> (i32, i32) {
    %c0_i32 = arith.constant 0 : i32
    %c0_i32_0 = arith.constant 0 : i32
    return %arg0, %c0_i32 : i32, i32
  }
  func.func @transform_1(%arg0: i32) -> (i32, i32) {
    %c0_i32 = arith.constant 0 : i32
    %c0_i32_0 = arith.constant 0 : i32
    return %arg0, %c0_i32 : i32, i32
  }
  func.func @transform_2(%arg0: i32) -> (i32, i32) {
    %c0_i32 = arith.constant 0 : i32
    %c0_i32_0 = arith.constant 0 : i32
    return %arg0, %c0_i32 : i32, i32
  }
  func.func @transform_3(%arg0: i32) -> (i32, i32) {
    %c0_i32 = arith.constant 0 : i32
    %c0_i32_0 = arith.constant 0 : i32
    %c0_i32_1 = arith.constant 0 : i32
    return %c0_i32, %c0_i32_0 : i32, i32
  }
  func.func @transform_4(%arg0: i32) -> (i32, i32) {
    %c0_i32 = arith.constant 0 : i32
    %c0_i32_0 = arith.constant 0 : i32
    %c0_i32_1 = arith.constant 0 : i32
    return %c0_i32, %c0_i32_0 : i32, i32
  }
  func.func @transform_5(%arg0: i32) -> (i32, i32) {
    %c0_i32 = arith.constant 0 : i32
    %c0_i32_0 = arith.constant 0 : i32
    %c0_i32_1 = arith.constant 0 : i32
    return %c0_i32, %c0_i32_0 : i32, i32
  }
  func.func @transform_6(%arg0: i32) -> (i32, i32) {
    %c0_i32 = arith.constant 0 : i32
    %c0_i32_0 = arith.constant 0 : i32
    return %arg0, %c0_i32 : i32, i32
  }
}

</mosaic_0001>

<bundles_post_ra>
// kernel: tpu_custom_call.1
= control target key start
LH: loop header
LB: loop body
LE: loop exit
PB: predicated region body
PF: predicated region fallthrough
CT: control target
= control target key end

     0   :  { %11 = vsyncpa [#allocation3], 0  ;;  %s656_s0 = inlined_call_operand.hbm [shape: f32[8,16], index: 0, kind: input, shape index: {}]   ;;  %s657_s1 = inlined_call_operand.hbm [shape: f32[8,32], index: 1, kind: input, shape index: {}]   ;;  %s658_s2 = inlined_call_operand.hbm [shape: f32[8,32], index: 2, kind: input, shape index: {}]   ;;  %s659_s3 = inlined_call_operand.hbm [shape: f32[16,128], index: 3, kind: input, shape index: {}]   ;;  %s660_s4 = inlined_call_operand.hbm [shape: f32[32,128], index: 4, kind: input, shape index: {}]   ;;  %s661_s5 = inlined_call_operand.vmem [shape: f32[1,128], index: 5, kind: input, shape index: {}]   ;;  %s662_s6 = inlined_call_operand.hbm [shape: f32[8,64], index: 6, kind: output, shape index: {}]  }
   0x1   :  { %12 = vsyncpa [#allocation6], 0 }
   0x2   :  { %13 = vsyncpa [#allocation9], 0 }
   0x3   :  { %14 = vsyncpa [#allocation4], 0  ;;  %s514_s21 = smov [#allocation5]   ;;  %s515_s23 = smov [#allocation8]  }
   0x4   :  { %s31_s22 = sshll.u32 %s514_s21, 4  ;;  %s50_s24 = sshll.u32 %s515_s23, 4  ;;  %s32_s22 = int_to_ptr.vmem [resolvable:$true] %s31_s22  ;;  %s563_s24 = int_to_ptr.vmem [resolvable:$true] %s50_s24 }
   0x5   :  { %s374_s27 = scalar_lea.hbm %s657_s1, 128 }
   0x6   :  { %p375_p0 = scmp.ne.s32.totalorder %s657_s1, %s374_s27  ;;  %p378_p1 = scmp.lt.u32.totalorder %s374_s27, %s657_s1 }
   0x8   :  { %p380_p2 = pnand %p378_p1, %p375_p0 }
   0xa   :  { %383 = shalt.err (!%p380_p2)
}
   0xb   :  { %s384_s8 = scalar_lea.vmem %s32_s22, 128  ;;  %p389_p4 = scmp.lt.s32.totalorder %s32_s22, %s32_s22 }
   0xc   :  { %p385_p3 = scmp.ne.s32.totalorder %s32_s22, %s384_s8  ;;  %p390_p5 = scmp.lt.s32.totalorder %s384_s8, %s384_s8 }
   0xe   :  { %p391_p6 = por %p390_p5, %p389_p4 }
  0x10   :  { %p392_p7 = pnand %p391_p6, %p385_p3 }
  0x12   :  { %395 = shalt.err (!%p392_p7)
}
  0x13   :  { %34 = dma.hbm_to_vmem [thread:$0]  %s657_s1, 128, %s32_s22, [#allocation6]  }
  0x14   :  { %s396_s13 = scalar_lea.hbm %s659_s3, 256 }
  0x15   :  { %p397_p8 = scmp.ne.s32.totalorder %s659_s3, %s396_s13  ;;  %p400_p9 = scmp.lt.u32.totalorder %s396_s13, %s659_s3 }
  0x17   :  { %p402_p10 = pnand %p400_p9, %p397_p8 }
  0x19   :  { %405 = shalt.err (!%p402_p10)
}
  0x1a   :  { %s406_s18 = scalar_lea.vmem %s563_s24, 256  ;;  %p411_p12 = scmp.lt.s32.totalorder %s563_s24, %s563_s24 }
  0x1b   :  { %p407_p11 = scmp.ne.s32.totalorder %s563_s24, %s406_s18  ;;  %p412_p13 = scmp.lt.s32.totalorder %s406_s18, %s406_s18 }
  0x1d   :  { %p413_p0 = por %p412_p13, %p411_p12 }
  0x1f   :  { %p414_p1 = pnand %p413_p0, %p407_p11 }
  0x21   :  { %417 = shalt.err (!%p414_p1)
}
  0x22   :  { %s516_s1 = smov 128   ;;  %s517_s19 = smov 8  }
  0x23   :  { %56 = dma.hbm_to_vmem [thread:$0]  %s659_s3, 256, %s563_s24, [#allocation9], %s516_s1, %s516_s1, %s517_s19  }
  0x24   :  { %s518_s22 = smov [#allocation2]   ;;  %s519_s25 = smov [#allocation7]  }
  0x25   :  { %s21_s23 = sshll.u32 %s518_s22, 4  ;;  %s41_s26 = sshll.u32 %s519_s25, 4  ;;  %s22_s23 = int_to_ptr.vmem [resolvable:$true] %s21_s23  ;;  %s42_s26 = int_to_ptr.vmem [resolvable:$true] %s41_s26 }
  0x26   :  { %s418_s29 = scalar_lea.hbm %s656_s0, 128 }
  0x27   :  { %p419_p2 = scmp.ne.s32.totalorder %s656_s0, %s418_s29  ;;  %p422_p3 = scmp.lt.u32.totalorder %s418_s29, %s656_s0 }
  0x29   :  { %p424_p4 = pnand %p422_p3, %p419_p2 }
  0x2b   :  { %427 = shalt.err (!%p424_p4)
}
  0x2c   :  { %s428_s3 = scalar_lea.vmem %s22_s23, 128  ;;  %p433_p6 = scmp.lt.s32.totalorder %s22_s23, %s22_s23 }
  0x2d   :  { %p429_p5 = scmp.ne.s32.totalorder %s22_s23, %s428_s3  ;;  %p434_p7 = scmp.lt.s32.totalorder %s428_s3, %s428_s3 }
  0x2f   :  { %p435_p8 = por %p434_p7, %p433_p6 }
  0x31   :  { %p436_p9 = pnand %p435_p8, %p429_p5 }
  0x33   :  { %439 = shalt.err (!%p436_p9)
}
  0x34   :  { %24 = dma.hbm_to_vmem [thread:$0]  %s656_s0, 128, %s22_s23, [#allocation3]  }
  0x35   :  { %s440_s13 = scalar_lea.hbm %s658_s2, 128 }
  0x36   :  { %p441_p10 = scmp.ne.s32.totalorder %s658_s2, %s440_s13  ;;  %p444_p11 = scmp.lt.u32.totalorder %s440_s13, %s658_s2 }
  0x38   :  { %p446_p12 = pnand %p444_p11, %p441_p10 }
  0x3a   :  { %449 = shalt.err (!%p446_p12)
}
  0x3b   :  { %s450_s18 = scalar_lea.vmem %s42_s26, 128  ;;  %p455_p0 = scmp.lt.s32.totalorder %s42_s26, %s42_s26 }
  0x3c   :  { %p451_p13 = scmp.ne.s32.totalorder %s42_s26, %s450_s18  ;;  %p456_p1 = scmp.lt.s32.totalorder %s450_s18, %s450_s18 }
  0x3e   :  { %p457_p2 = por %p456_p1, %p455_p0 }
  0x40   :  { %p458_p3 = pnand %p457_p2, %p451_p13 }
  0x42   :  { %461 = shalt.err (!%p458_p3)
}
  0x43   :  { %44 = dma.hbm_to_vmem [thread:$0]  %s658_s2, 128, %s42_s26, [#allocation6]  }
  0x44   :  { %s520_s21 = smov [#allocation10]   ;;  %s462_s27 = scalar_lea.hbm %s660_s4, 512 }
  0x45   :  { %s62_s22 = sshll.u32 %s520_s21, 4  ;;  %p463_p4 = scmp.ne.s32.totalorder %s660_s4, %s462_s27  ;;  %s63_s22 = int_to_ptr.vmem [resolvable:$true] %s62_s22 }
  0x46   :  { %p466_p5 = scmp.lt.u32.totalorder %s462_s27, %s660_s4 }
  0x48   :  { %p468_p6 = pnand %p466_p5, %p463_p4 }
  0x4a   :  { %471 = shalt.err (!%p468_p6)
}
  0x4b   :  { %s472_s8 = scalar_lea.vmem %s63_s22, 512  ;;  %p477_p8 = scmp.lt.s32.totalorder %s63_s22, %s63_s22 }
  0x4c   :  { %p473_p7 = scmp.ne.s32.totalorder %s63_s22, %s472_s8  ;;  %p478_p9 = scmp.lt.s32.totalorder %s472_s8, %s472_s8 }
  0x4e   :  { %p479_p10 = por %p478_p9, %p477_p8 }
  0x50   :  { %p480_p11 = pnand %p479_p10, %p473_p7 }
  0x52   :  { %483 = shalt.err (!%p480_p11)
}
  0x53   :  { %68 = dma.hbm_to_vmem [thread:$0]  %s660_s4, 512, %s63_s22, [#allocation9], %s516_s1, %s516_s1, %s517_s19  }
  0x54   :  { %506 = dma.done.wait [#allocation3], 128  }
  0x55   :  { %507 = vsyncadd [#allocation3], 4294967168 }
  0x56   :  { %508 = dma.done.wait [#allocation6], 256  }
  0x57   :  { %509 = vsyncadd [#allocation6], 4294967040 }
  0x58   :  { %510 = dma.done.wait [#allocation9], 768  }
  0x59   :  { %511 = vsyncadd [#allocation9], 4294966528  ;;  %v521_v0 = vmov 0.0|0.0   ;;  %vm522_vm0 = vmmov 0   ;;  %v523_v1 = vmov 0.0   ;;  %v90_v2 = vld [vmem:[#allocation10] sm:$0xff]  ;;  %v251_v23 = vlaneseq }
  0x5a   :  { %343 = vmatprep.subr.bf16.mxu0 %v521_v0  ;;  %349 = vmatprep.subr.bf16.mxu1 %v521_v0  ;;  %v91_v3 = vld [vmem:[#allocation10 + $0x8] sm:$0xff]  ;;  %v87_v4 = vld [vmem:[#allocation8] sm:$0xff]  ;;  %v88_v6 = vld [vmem:[#allocation8 + $0x8] sm:$0xff]  ;;  %s524_s4 = smov 32   ;;  %vm168_vm1 = vcmask 130048   ;;  %vm94_vm2 = vcmask 261120  }
  0x5b   :  { %340 = vmatprep.mubr.msk.f32.mxu1 %vm522_vm0, %v523_v1  ;;  %333 = vmatprep.mubr.msk.f32.mxu0 %vm522_vm0, %v523_v1  ;;  %v344_v5 = vpack.c.bf16 %v91_v3, %v90_v2  ;;  %v92_v7 = vld [vmem:[#allocation10 + $0x10] sm:$0xff]  ;;  %v93_v8 = vld [vmem:[#allocation10 + $0x18] sm:$0xff]  ;;  %v350_v9 = vpack.c.bf16 %v88_v6, %v87_v4  ;;  %v250_v10 = vld [vmem:[#allocation7] sm:$0xff]  ;;  %v252_v25 = vand.u32 127, %v251_v23  ;;  %s526_s9 = smov 96   ;;  %s527_s3 = smov [#allocation11]  }
  0x5c   :  { %v347_v11 = vpack.c.bf16 %v93_v8, %v92_v7  ;;  %270 = vrot.lane.b32.xlu0 %v250_v10, %s524_s4  ;;  %v86_v12 = vld [vmem:[#allocation2] sm:$0xff]  ;;  %v89_v13 = vld [vmem:[#allocation5] sm:$0xff]  ;;  %s302_s24 = sshll.u32 %s527_s3, 4  ;;  %vm294_vm6 = vcmask 523264   ;;  %s303_s24 = int_to_ptr.vmem [resolvable:$true] %s302_s24 }
  0x5d   :  { %345 = vmatpush3.bf16.msra.mxu0 %v344_v5  ;;  %351 = vmatpush3.bf16.msra.mxu1 %v350_v9  ;;  %v315_v17 = vld [vmem:[%s661_s5] ss:$0 sm:$0xff]  ;;  %vm253_vm3 = vcmp.ge.s32.totalorder %v252_v25, 64  ;;  %vm254_vm4 = vcmp.lt.s32.totalorder %v252_v25, 96  ;;  %s525_s5 = smov 64   ;;  %s484_s10 = scalar_lea.vmem %s303_s24, 128 }
  0x5e   :  { %346 = vmatprep.subr.bf16.mxu0 %v521_v0  ;;  %vm255_vm5 = vmand %vm253_vm3, %vm254_vm4  ;;  %p485_p12 = scmp.ne.s32.totalorder %s303_s24, %s484_s10  ;;  %p489_p13 = scmp.lt.s32.totalorder %s303_s24, %s303_s24 }
  0x5f   :  { %p490_p0 = scmp.lt.s32.totalorder %s484_s10, %s484_s10 }
  0x60   :  { %341 = vmatmul.mubr.msk.f32.vlgmr.msra.gmra.mrb[0].mxu1 %vm168_vm1, %v86_v12 }
  0x61   :  { %348 = vmatpush3.bf16.msra.mxu0 %v347_v11  ;;  %p491_p1 = por %p490_p0, %p489_p13 }
  0x63   :  { %p492_p2 = pnand %p491_p1, %p485_p12 }
  0x64   :  { %334 = vmatmul.mubr.msk.f32.vlgmr.msra.gmra.mrb[0].mxu0 %vm94_vm2, %v89_v13 }
  0xce   :  { %v271_v27 = vpop.permute.xlu0 %270 }
 0x133   :  { %v238_v14 = vpop.f32.mrb[0].mxu1 }
 0x134   :  { %v342_v15 = vpop.f32.mrb[1].mxu1 }
 0x137   :  { %v164_v16 = vpop.f32.mrb[0].mxu0 }
 0x138   :  { %v239_v18 = vadd.f32 %v238_v14, %v164_v16  ;;  %v335_v19 = vpop.f32.mrb[1].mxu0 }
 0x13a   :  { %v249_v20 = vadd.f32 %v315_v17, %v239_v18 }
 0x13c   :  { %v316_v21 = vmul.f32 -1.442695, %v249_v20 }
 0x13e   :  { %366 = vpow2.f32 %v316_v21 }
 0x13f   :  { %368 = vtanh.f32 %v249_v20 }
 0x148   :  { %v367_v22 = vpop.eup %366 }
 0x149   :  { %v260_v24 = vadd.f32 1.0, %v367_v22  ;;  %v369_v26 = vpop.eup %368 }
 0x14b   :  { %370 = vrcp.f32 %v260_v24 }
 0x155   :  { %v371_v28 = vpop.eup %370 }
 0x156   :  { %v263_v29 = vsel %vm255_vm5, %v369_v26, %v371_v28 }
 0x157   :  { %v273_v30 = vmul.f32 %v271_v27, %v263_v29  ;;  %265 = vrot.lane.b32.xlu0 %v263_v29, %s525_s5 }
 0x159   :  { %275 = vrot.lane.b32.xlu1 %v273_v30, %s526_s9 }
 0x1c9   :  { %v266_v31 = vpop.permute.xlu0 %265 }
 0x1ca   :  { %v268_v32 = vmul.f32 %v266_v31, %v263_v29 }
 0x1cb   :  { %v276_v33 = vpop.permute.xlu1 %275 }
 0x1cc   :  { %v278_v34 = vadd.f32 %v276_v33, %v268_v32 }
 0x1ce   :  { %372 = vtanh.f32 %v278_v34 }
 0x1d8   :  { %v373_v35 = vpop.eup %372 }
 0x1d9   :  { %281 = vrot.lane.b32.xlu1 %v373_v35, %s526_s9 }
 0x1dd   :  { %290 = vrot.lane.b32.xlu1 %v278_v34, %s524_s4 }
 0x24b   :  { %v282_v36 = vpop.permute.xlu1 %281 }
 0x24c   :  { %v284_v37 = vmul.f32 %v282_v36, %v263_v29 }
 0x24e   :  { %286 = vrot.lane.b32.xlu0 %v284_v37, %s524_s4 }
 0x24f   :  { %v291_v38 = vpop.permute.xlu1 %290 }
 0x2c0   :  { %v287_v39 = vpop.permute.xlu0 %286 }
 0x2c1   :  { %v293_v40 = vsel %vm94_vm2, %v287_v39, %v291_v38 }
 0x2c2   :  { %295 = vst.msk [vmem:[#allocation11] sm:$0xff] %vm294_vm6, %v293_v40 }
 0x2c3   :  { %495 = shalt.err (!%p492_p2)
}
 0x2c4   :  { %s496_s13 = scalar_lea.hbm %s662_s6, 128 }
 0x2c5   :  { %p497_p3 = scmp.ne.s32.totalorder %s662_s6, %s496_s13  ;;  %p500_p4 = scmp.lt.u32.totalorder %s496_s13, %s662_s6 }
 0x2c7   :  { %p502_p5 = pnand %p500_p4, %p497_p3 }
 0x2c9   :  { %505 = shalt.err (!%p502_p5)
}
 0x2ca   :  { %305 = dma.vmem_to_hbm [thread:$0]  %s303_s24, 128, %s662_s6, [#allocation4]  }
 0x2cb   :  { %512 = dma.done.wait [#allocation4], 128  }
 0x2cc   :  { %513 = vsyncadd [#allocation4], 4294967168 }
 0x2cd   :  { %309 = vsyncpa [#allocation3], 1 }
 0x2ce   :  { %310 = vsyncpa [#allocation6], 1 }
 0x2cf   :  { %311 = vsyncpa [#allocation9], 1 }
 0x2d0   :  { %312 = vsyncpa [#allocation4], 1 }

</bundles_post_ra>
